<compile_context>
chip_gen: v7x
topology: tpu7x:2x2x1
jax: 0.10.0
libtpu: 0.0.40
codegen_flags: <defaults>
</compile_context>

<pallas_src>
import functools

import jax
import jax.numpy as jnp
from jax.experimental import pallas as pl
from jax.experimental.pallas import tpu as pltpu


# --------------------------------------------------------------------------- #
# Kernels
# --------------------------------------------------------------------------- #
def _se_fused_kernel(x_ref, w1t_ref, b1_ref, w2t_ref, b2_ref, o_ref, *, inv_hw):
    """Fused SE forward for one batch block.

    x_ref/o_ref: (Nb, C, HW)   w1t_ref: (C, Cr)  b1_ref: (1, Cr)
    w2t_ref: (Cr, C)           b2_ref: (1, C)
    """
    # AdaptiveAvgPool2d(1): f32-accumulated sum over the spatial lane axis.
    pooled = jnp.sum(x_ref[...], axis=-1, dtype=jnp.float32) * inv_hw    # (Nb, C)

    # conv1 (1x1) + ReLU.
    h = jnp.dot(pooled, w1t_ref[...], preferred_element_type=jnp.float32)
    h = jnp.maximum(h + b1_ref[...], 0.0)                                # (Nb, Cr)

    # conv2 (1x1) + hardsigmoid == clip(x/6 + 1/2, 0, 1).
    g = jnp.dot(h, w2t_ref[...], preferred_element_type=jnp.float32) + b2_ref[...]
    g = jnp.clip(g * (1.0 / 6.0) + 0.5, 0.0, 1.0)                        # (Nb, C)

    # Explicit second VMEM read of x; avoids keeping the whole block live as a
    # single bound value across the gate computation (vreg pressure).
    o_ref[...] = (x_ref[...] * g.astype(o_ref.dtype)[:, :, None]).astype(o_ref.dtype)


def _se_pool_kernel(x_ref, sum_ref, acc_ref, *, hw, thw):
    """Spatial-tiled pooling sweep (fallback path for huge per-sample slabs).

    x_ref: (1, C, thw)   sum_ref: (1, 1, C) f32   acc_ref: (1, C) f32 scratch
    """
    s = pl.program_id(1)

    @pl.when(s == 0)
    def _():
        acc_ref[...] = jnp.zeros_like(acc_ref)

    x = x_ref[...]
    # Mask lanes past the true H*W (partial last spatial tile reads garbage).
    lane = jax.lax.broadcasted_iota(jnp.int32, x.shape, 2) + s * thw
    xm = jnp.where(lane < hw, x, jnp.zeros((), x.dtype))
    acc_ref[...] += jnp.sum(xm, axis=-1, dtype=jnp.float32)              # (1, C)

    @pl.when(s == pl.num_programs(1) - 1)
    def _():
        sum_ref[...] = acc_ref[...][:, None, :]                          # (1, 1, C)


def _se_scale_kernel(x_ref, g_ref, o_ref):
    """Spatial-tiled scale sweep (fallback second pass): out = x * gate."""
    g = g_ref[...].astype(o_ref.dtype)                                   # (1, C, 1)
    o_ref[...] = (x_ref[...] * g).astype(o_ref.dtype)


# --------------------------------------------------------------------------- #
# Wrapper
# --------------------------------------------------------------------------- #
def _vmem_capacity_bytes():
    try:
        return int(pltpu.get_tpu_info().vmem_capacity_bytes)
    except Exception:
        return 64 << 20      # assume the smallest per-TC VMEM (v7x) when unknown


def se_module_forward(x_nchw, w1, b1, w2, b2, *, block_budget_bytes=None):
    """SEModule forward.

    x_nchw: (N, C, H, W); w1: (Cr, C, 1, 1); b1: (Cr,); w2: (C, Cr, 1, 1); b2: (C,).
    """
    N, C, H, W = x_nchw.shape
    Cr = w1.shape[0]
    HW = H * W
    itemsize = jnp.dtype(x_nchw.dtype).itemsize

    # Generation-aware sizing: v5e/v6e (128 MiB VMEM) get bigger blocks and a
    # higher vmem ceiling; v7x (64 MiB per TC) keeps the conservative budget.
    big_vmem = _vmem_capacity_bytes() >= (100 << 20)
    if block_budget_bytes is None:
        block_budget_bytes = (14 << 20) if big_vmem else (6 << 20)
    vmem_ceiling = (96 << 20) if big_vmem else (48 << 20)

    # Free, contiguous reshape only -- no pad/slice round-trips through HBM.
    x = x_nchw.reshape(N, C, HW)

    # 1x1-conv weights as plain matmuls (tiny; kept resident in VMEM as f32).
    w1t = w1.reshape(Cr, C).T.astype(jnp.float32)      # (C, Cr)
    w2t = w2.reshape(C, Cr).T.astype(jnp.float32)      # (Cr, C)
    b1_2d = b1.reshape(1, Cr).astype(jnp.float32)
    b2_2d = b2.reshape(1, C).astype(jnp.float32)
    param_bytes = 4 * (w1t.size + w2t.size + b1_2d.size + b2_2d.size)

    per_sample = C * HW * itemsize

    if per_sample <= block_budget_bytes:
        # ---- Fused single-pass path: grid over batch blocks. -----------------
        nb = int(max(1, min(N, block_budget_bytes // max(per_sample, 1))))
        if N >= 2:
            # Keep >= 2 grid steps so the "parallel" axis shards across both
            # TensorCores on v7x.
            nb = min(nb, -(-N // 2))
        grid_n = pl.cdiv(N, nb)          # uneven last batch block: stores masked

        block_bytes = nb * per_sample
        vmem_limit = int(min(max(4 * block_bytes + 2 * param_bytes + (2 << 20),
                                 8 << 20), vmem_ceiling))
        cost = pl.CostEstimate(
            flops=2 * N * C * HW + 4 * N * C * Cr,
            transcendentals=0,
            bytes_accessed=2 * N * C * HW * itemsize + param_bytes)

        out = pl.pallas_call(
            functools.partial(_se_fused_kernel, inv_hw=1.0 / HW),
            out_shape=jax.ShapeDtypeStruct((N, C, HW), x.dtype),
            grid=(grid_n,),
            in_specs=[
                pl.BlockSpec((nb, C, HW), lambda n: (n, 0, 0)),   # x: streamed
                pl.BlockSpec((C, Cr), lambda n: (0, 0)),          # w1t: resident
                pl.BlockSpec((1, Cr), lambda n: (0, 0)),          # b1: resident
                pl.BlockSpec((Cr, C), lambda n: (0, 0)),          # w2t: resident
                pl.BlockSpec((1, C), lambda n: (0, 0)),           # b2: resident
            ],
            out_specs=pl.BlockSpec((nb, C, HW), lambda n: (n, 0, 0)),
            compiler_params=pltpu.CompilerParams(
                dimension_semantics=("parallel",),
                vmem_limit_bytes=vmem_limit),
            cost_estimate=cost,
        )(x, w1t, b1_2d, w2t, b2_2d)
        return out.reshape(N, C, H, W)

    # ---- Fallback: a single sample's (C, H*W) slab exceeds the VMEM budget. ----
    # Two spatially-tiled sweeps: (1) masked pooling accumulation, (2) scale.
    # TODO(synk): if even a single (1, C, 128) tile exceeds the budget (huge C),
    # additionally tile the channel axis.
    thw_budget = max(1, block_budget_bytes // (C * itemsize))
    thw = HW if thw_budget >= HW else max(128, (thw_budget // 128) * 128)
    grid_s = pl.cdiv(HW, thw)
    tile_bytes = C * thw * itemsize
    vmem_limit = int(min(max(4 * tile_bytes + 2 * param_bytes + (2 << 20),
                             8 << 20), vmem_ceiling))

    sums = pl.pallas_call(
        functools.partial(_se_pool_kernel, hw=HW, thw=thw),
        out_shape=jax.ShapeDtypeStruct((N, 1, C), jnp.float32),
        grid=(N, grid_s),
        in_specs=[pl.BlockSpec((1, C, thw), lambda n, s: (n, 0, s))],
        out_specs=pl.BlockSpec((1, 1, C), lambda n, s: (n, 0, 0)),
        scratch_shapes=[pltpu.VMEM((1, C), jnp.float32)],
        compiler_params=pltpu.CompilerParams(
            dimension_semantics=("parallel", "arbitrary"),
            vmem_limit_bytes=vmem_limit),
        cost_estimate=pl.CostEstimate(
            flops=N * C * HW, transcendentals=0,
            bytes_accessed=N * C * HW * itemsize + N * C * 4),
    )(x)

    # Tiny gate MLP ((N,C) x (C,Cr) ...) stays in plain JAX -- negligible cost.
    pooled = sums.reshape(N, C) * (1.0 / HW)
    h = jnp.maximum(pooled @ w1t + b1_2d, 0.0)
    gate = jnp.clip((h @ w2t + b2_2d) * (1.0 / 6.0) + 0.5, 0.0, 1.0)
    gate = gate.reshape(N, C, 1).astype(jnp.float32)

    out = pl.pallas_call(
        _se_scale_kernel,
        out_shape=jax.ShapeDtypeStruct((N, C, HW), x.dtype),
        grid=(N, grid_s),
        in_specs=[
            pl.BlockSpec((1, C, thw), lambda n, s: (n, 0, s)),
            pl.BlockSpec((1, C, 1), lambda n, s: (n, 0, 0)),
        ],
        out_specs=pl.BlockSpec((1, C, thw), lambda n, s: (n, 0, s)),
        compiler_params=pltpu.CompilerParams(
            dimension_semantics=("parallel", "parallel"),
            vmem_limit_bytes=vmem_limit),
        cost_estimate=pl.CostEstimate(
            flops=N * C * HW, transcendentals=0,
            bytes_accessed=2 * N * C * HW * itemsize + N * C * 4),
    )(x, gate)
    return out.reshape(N, C, H, W)


def se_module_reference(x_nchw, w1, b1, w2, b2):
    """Pure-JAX reference mirroring the PyTorch forward."""
    N, C, H, W = x_nchw.shape
    Cr = w1.shape[0]
    pooled = jnp.mean(x_nchw.astype(jnp.float32), axis=(2, 3))       # (N, C)
    h = jnp.maximum(pooled @ w1.reshape(Cr, C).T + b1, 0.0)          # (N, Cr)
    s = h @ w2.reshape(C, Cr).T + b2                                 # (N, C)
    s = jnp.clip(s / 6.0 + 0.5, 0.0, 1.0)
    return x_nchw * s[:, :, None, None].astype(x_nchw.dtype)


if __name__ == "__main__":
    key = jax.random.PRNGKey(0)
    k_x, k_w1, k_b1, k_w2, k_b2, k_x2 = jax.random.split(key, 6)
    reduction = 4

    # --- Primary check: small SE shapes, fused single-pass path. -------------
    N, C, H, W = 2, 4, 16, 16
    Cr = C // reduction
    x = jax.random.normal(k_x, (N, C, H, W), dtype=jnp.float32)
    w1 = jax.random.normal(k_w1, (Cr, C, 1, 1), dtype=jnp.float32) * 0.5
    b1 = jax.random.normal(k_b1, (Cr,), dtype=jnp.float32) * 0.1
    w2 = jax.random.normal(k_w2, (C, Cr, 1, 1), dtype=jnp.float32) * 0.5
    b2 = jax.random.normal(k_b2, (C,), dtype=jnp.float32) * 0.1

    out = jax.block_until_ready(se_module_forward(x, w1, b1, w2, b2))
    ref = se_module_reference(x, w1, b1, w2, b2)
    assert out.shape == (N, C, H, W)
    assert jnp.allclose(out, ref, atol=1e-5, rtol=1e-5), "fused path mismatch"

    # --- Secondary check: non-128-multiple H*W + uneven batch grid. ----------
    N2, C2, H2, W2 = 3, 8, 13, 13
    Cr2 = C2 // reduction
    x2 = jax.random.normal(k_x2, (N2, C2, H2, W2), dtype=jnp.float32)
    w1b = jax.random.normal(k_w1, (Cr2, C2, 1, 1), dtype=jnp.float32) * 0.5
    b1b = jax.random.normal(k_b1, (Cr2,), dtype=jnp.float32) * 0.1
    w2b = jax.random.normal(k_w2, (C2, Cr2, 1, 1), dtype=jnp.float32) * 0.5
    b2b = jax.random.normal(k_b2, (C2,), dtype=jnp.float32) * 0.1

    out2 = jax.block_until_ready(se_module_forward(x2, w1b, b1b, w2b, b2b))
    ref2 = se_module_reference(x2, w1b, b1b, w2b, b2b)
    assert jnp.allclose(out2, ref2, atol=1e-5, rtol=1e-5), "uneven-grid mismatch"

    # --- Tertiary check: force the spatial-tiled fallback (tiny budget). -----
    out3 = jax.block_until_ready(
        se_module_forward(x2, w1b, b1b, w2b, b2b, block_budget_bytes=4096))
    assert jnp.allclose(out3, ref2, atol=1e-5, rtol=1e-5), "fallback path mismatch"

    print("KERNEL_OK")
</pallas_src>

<mosaic_0001>
module attributes {stable_mosaic.version = 11 : i64} {
  func.func @_se_fused_kernel(%arg0: i32, %arg1: memref<1x4x256xf32, #tpu.memory_space<vmem>>, %arg2: memref<4x1xf32, #tpu.memory_space<vmem>>, %arg3: memref<1x1xf32, #tpu.memory_space<vmem>>, %arg4: memref<1x4xf32, #tpu.memory_space<vmem>>, %arg5: memref<1x4xf32, #tpu.memory_space<vmem>>, %arg6: memref<1x4x256xf32, #tpu.memory_space<vmem>>) attributes {dimension_semantics = [#tpu.dimension_semantics<parallel>], iteration_bounds = array<i64: 2>, scalar_prefetch = 0 : i64, scratch_operands = 0 : i64, tpu.core_type = #tpu.core_type<tc>, window_params = [{transform_indices = @transform_0, window_bounds = array<i64: 1, 4, 256>}, {pipeline_mode = #tpu.pipeline_mode<synchronous>, transform_indices = @transform_1, window_bounds = array<i64: 4, 1>}, {pipeline_mode = #tpu.pipeline_mode<synchronous>, transform_indices = @transform_2, window_bounds = array<i64: 1, 1>}, {pipeline_mode = #tpu.pipeline_mode<synchronous>, transform_indices = @transform_3, window_bounds = array<i64: 1, 4>}, {pipeline_mode = #tpu.pipeline_mode<synchronous>, transform_indices = @transform_4, window_bounds = array<i64: 1, 4>}, {transform_indices = @transform_5, window_bounds = array<i64: 1, 4, 256>}]} {
    %c0 = arith.constant 0 : index
    %c0_0 = arith.constant 0 : index
    %c0_1 = arith.constant 0 : index
    %0 = vector.load %arg1[%c0, %c0_0, %c0_1] : memref<1x4x256xf32, #tpu.memory_space<vmem>>, vector<1x4x256xf32>
    %cst = arith.constant dense<0.000000e+00> : vector<1x4xf32>
    %1 = vector.multi_reduction <add>, %0, %cst [2] : vector<1x4x256xf32> to vector<1x4xf32>
    %cst_2 = arith.constant 3.906250e-03 : f32
    %2 = vector.broadcast %cst_2 : f32 to vector<1x4xf32>
    %3 = arith.mulf %1, %2 : vector<1x4xf32>
    %c0_3 = arith.constant 0 : index
    %c0_4 = arith.constant 0 : index
    %4 = vector.load %arg2[%c0_3, %c0_4] : memref<4x1xf32, #tpu.memory_space<vmem>>, vector<4x1xf32>
    %cst_5 = arith.constant dense<0.000000e+00> : vector<1x1xf32>
    %5 = tpu.matmul %3, %4, %cst_5 {dimension_numbers = #tpu.dot_dimension_numbers<[1], [0], [0], [1], [0, 0, 1, 1], [], []>} : vector<1x4xf32>, vector<4x1xf32>, vector<1x1xf32> -> vector<1x1xf32>
    %c0_6 = arith.constant 0 : index
    %c0_7 = arith.constant 0 : index
    %6 = vector.load %arg3[%c0_6, %c0_7] : memref<1x1xf32, #tpu.memory_space<vmem>>, vector<1x1xf32>
    %7 = arith.addf %5, %6 : vector<1x1xf32>
    %cst_8 = arith.constant 0.000000e+00 : f32
    %8 = vector.broadcast %cst_8 : f32 to vector<1x1xf32>
    %9 = arith.maximumf %7, %8 : vector<1x1xf32>
    %c0_9 = arith.constant 0 : index
    %c0_10 = arith.constant 0 : index
    %10 = vector.load %arg4[%c0_9, %c0_10] : memref<1x4xf32, #tpu.memory_space<vmem>>, vector<1x4xf32>
    %cst_11 = arith.constant dense<0.000000e+00> : vector<1x4xf32>
    %11 = tpu.matmul %9, %10, %cst_11 {dimension_numbers = #tpu.dot_dimension_numbers<[1], [0], [0], [1], [0, 0, 1, 1], [], []>} : vector<1x1xf32>, vector<1x4xf32>, vector<1x4xf32> -> vector<1x4xf32>
    %c0_12 = arith.constant 0 : index
    %c0_13 = arith.constant 0 : index
    %12 = vector.load %arg5[%c0_12, %c0_13] : memref<1x4xf32, #tpu.memory_space<vmem>>, vector<1x4xf32>
    %13 = arith.addf %11, %12 : vector<1x4xf32>
    %cst_14 = arith.constant 0.166666672 : f32
    %14 = vector.broadcast %cst_14 : f32 to vector<1x4xf32>
    %15 = arith.mulf %13, %14 : vector<1x4xf32>
    %cst_15 = arith.constant 5.000000e-01 : f32
    %16 = vector.broadcast %cst_15 : f32 to vector<1x4xf32>
    %17 = arith.addf %15, %16 : vector<1x4xf32>
    %cst_16 = arith.constant 0.000000e+00 : f32
    %cst_17 = arith.constant 1.000000e+00 : f32
    %18 = vector.broadcast %cst_16 : f32 to vector<1x4xf32>
    %19 = arith.maximumf %18, %17 : vector<1x4xf32>
    %20 = vector.broadcast %cst_17 : f32 to vector<1x4xf32>
    %21 = arith.minimumf %20, %19 : vector<1x4xf32>
    %c0_18 = arith.constant 0 : index
    %c0_19 = arith.constant 0 : index
    %c0_20 = arith.constant 0 : index
    %22 = vector.load %arg1[%c0_18, %c0_19, %c0_20] : memref<1x4x256xf32, #tpu.memory_space<vmem>>, vector<1x4x256xf32>
    %23 = vector.shape_cast %21 : vector<1x4xf32> to vector<1x4x1xf32>
    %24 = vector.broadcast %23 : vector<1x4x1xf32> to vector<1x4x256xf32>
    %25 = arith.mulf %22, %24 : vector<1x4x256xf32>
    %c0_21 = arith.constant 0 : index
    %c0_22 = arith.constant 0 : index
    %c0_23 = arith.constant 0 : index
    %26 = vector.load %arg6[%c0_21, %c0_22, %c0_23] : memref<1x4x256xf32, #tpu.memory_space<vmem>>, vector<1x4x256xf32>
    tpu.vector_store %arg6[%c0_21, %c0_22, %c0_23], %25 {strides = array<i32>} : memref<1x4x256xf32, #tpu.memory_space<vmem>>, vector<1x4x256xf32>,
    return
  }
  func.func @transform_0(%arg0: i32) -> (i32, i32, i32) {
    %c0_i32 = arith.constant 0 : i32
    %c0_i32_0 = arith.constant 0 : i32
    %c0_i32_1 = arith.constant 0 : i32
    return %arg0, %c0_i32, %c0_i32_0 : i32, i32, i32
  }
  func.func @transform_1(%arg0: i32) -> (i32, i32) {
    %c0_i32 = arith.constant 0 : i32
    %c0_i32_0 = arith.constant 0 : i32
    %c0_i32_1 = arith.constant 0 : i32
    return %c0_i32, %c0_i32_0 : i32, i32
  }
  func.func @transform_2(%arg0: i32) -> (i32, i32) {
    %c0_i32 = arith.constant 0 : i32
    %c0_i32_0 = arith.constant 0 : i32
    %c0_i32_1 = arith.constant 0 : i32
    return %c0_i32, %c0_i32_0 : i32, i32
  }
  func.func @transform_3(%arg0: i32) -> (i32, i32) {
    %c0_i32 = arith.constant 0 : i32
    %c0_i32_0 = arith.constant 0 : i32
    %c0_i32_1 = arith.constant 0 : i32
    return %c0_i32, %c0_i32_0 : i32, i32
  }
  func.func @transform_4(%arg0: i32) -> (i32, i32) {
    %c0_i32 = arith.constant 0 : i32
    %c0_i32_0 = arith.constant 0 : i32
    %c0_i32_1 = arith.constant 0 : i32
    return %c0_i32, %c0_i32_0 : i32, i32
  }
  func.func @transform_5(%arg0: i32) -> (i32, i32, i32) {
    %c0_i32 = arith.constant 0 : i32
    %c0_i32_0 = arith.constant 0 : i32
    %c0_i32_1 = arith.constant 0 : i32
    return %arg0, %c0_i32, %c0_i32_0 : i32, i32, i32
  }
}

</mosaic_0001>

<bundles_post_ra>
// kernel: tpu_custom_call.1
= control target key start
LH: loop header
LB: loop body
LE: loop exit
PB: predicated region body
PF: predicated region fallthrough
CT: control target
= control target key end

     0   :  { %s921_s0 = inlined_call_operand.hbm [shape: f32[2,4,256], index: 0, kind: input, shape index: {}]   ;;  %s922_s1 = inlined_call_operand.vmem [shape: f32[4,1], index: 1, kind: input, shape index: {}]   ;;  %s923_s2 = inlined_call_operand.<no memory space> [shape: f32[1,1], index: 2, kind: input, shape index: {}]   ;;  %s924_s3 = inlined_call_operand.vmem [shape: f32[1,4], index: 3, kind: input, shape index: {}]   ;;  %s925_s4 = inlined_call_operand.vmem [shape: f32[1,4], index: 4, kind: input, shape index: {}]   ;;  %s926_s5 = inlined_call_operand.hbm [shape: f32[2,4,256], index: 5, kind: output, shape index: {}]  }
   0x1   :  { %v10_v0 = vstv %s923_s2 }
   0x2   :  { %11 = vst [vmem:[#allocation2] sm:$0x1] %v10_v0 }
   0x3   :  { %12 = vsyncpa [#allocation4], 0 }
   0x4   :  { %14 = vsyncpa [#allocation4 + $0x1], 0 }
   0x5   :  { %15 = vsyncpa [#allocation5], 0 }
   0x6   :  { %17 = vsyncpa [#allocation5 + $0x1], 0  ;;  %s747_s20 = smov 0   ;;  %s749_s21 = smov 0  }
   0x7   :  { %s751_s22 = smov 0   ;;  %s753_s23 = smov 0  }
   0x8 LB: > { %s768_s2 = sadd.s32 4294967295, %s707_s23   ;;  %s527_s24 = sadd.s32 4294967294, %s707_s23   ;;  %s707_s23 = sphi %s753_s23, %s941_s23   ;;  %s703_s22 = sphi %s751_s22, %s940_s22   ;;  %s699_s21 = sphi %s749_s21, %s939_s21   ;;  %s695_s20 = sphi %s747_s20, %s938_s20  }
   0x9   : > { %s772_s25 = sadd.s32 1, %s707_s23   ;;  %s30_s26 = sadd.s32 1, %s703_s22 }
   0xa   : > { %s27_s27 = ssub.s32 %s707_s23, %s772_s25  ;;  %p37_p0 = scmp.ne.s32.totalorder %s703_s22, %s699_s21 }
   0xb   : > { %p28_p1 = scmp.eq.s32.totalorder %s27_s27, 0  ;;  %p38_p2 = scmp.eq.s32.totalorder %s707_s23, 0 }
   0xc   : > { %p43_p3 = scmp.ne.s32.totalorder %s699_s21, %s695_s20  ;;  %p44_p4 = scmp.eq.s32.totalorder %s768_s2, 0 }
   0xd   : > { %s784_s28 = scalar_select %p28_p1, %s703_s22, %s30_s26  }
   0xe   : > { %p786_p5 = por %p38_p2, %p37_p0  ;;  %p790_p6 = por %p44_p4, %p43_p3 }
   0xf   : > { %p151_p7 = scmp.eq.s32.totalorder %s768_s2, 1  ;;  %p157_p8 = scmp.eq.s32.totalorder %s527_s24, 1 }
  0x10   : > { %p573_p10 = scmp.lt.s32.totalorder %s707_s23, 2  ;;  %s189_s8 = sand.u32 1, %s703_s22  }
  0x11   : > { %p797_p11 = por %p151_p7, %p37_p0  ;;  %p801_p12 = por %p157_p8, %p43_p3 }
  0x12   : > { %s545_s9 = sshll.u32 %s707_s23, 7  ;;  %s530_s10 = sshll.u32 %s189_s8, 3 }
  0x13   : > { %s930_s6 = scalar_select %p797_p11, 1, 0 }
  0x14   : > { %s931_s7 = scalar_select %p801_p12, 1, 0 }
  0x15   : > { %s810_s13 = scalar_lea.hbm %s921_s0, %s545_s9  ;;  %s193_s14 = scalar_lea.vmem [#allocation3], %s530_s10 }
  0x16   : > { %s201_s15 = sshll.u32 %s193_s14, 4  ;;  %p814_p13 = pnand %p573_p10, %p786_p5  ;;  %s818_s15 = int_to_ptr.vmem [resolvable:$true] %s201_s15 }
  0x17   : > { %s190_s17 = scalar_lea.sflag [#allocation4], %s189_s8  ;;  %s611_s18 = scalar_lea.hbm %s810_s13, 128 }
  0x18   : > { %p612_p2 = scmp.ne.s32.totalorder %s810_s13, %s611_s18  ;;  %p613_p3 = pneg %p814_p13 }
  0x19   : > { %s616_s26 = scalar_lea.hbm %s921_s0, 256  ;;  %p617_p5 = scmp.lt.u32.totalorder %s810_s13, %s921_s0 }
  0x1a   : > { %p614_p4 = pnand %p613_p3, %p612_p2  ;;  %p618_p8 = scmp.lt.u32.totalorder %s616_s26, %s611_s18 }
  0x1b   : > { %p620_p9 = scmp.lt.u32.totalorder %s611_s18, %s810_s13 }
  0x1c   : > { %p615_p7 = pneg %p614_p4  ;;  %p619_p10 = por %p618_p8, %p617_p5 }
  0x1e   : > { %p621_p0 = por %p620_p9, %p619_p10 }
  0x20   : > { %p622_p1 = pnand %p621_p0, %p615_p7 }
  0x22   : > { %625 = shalt.err (!%p622_p1)
}
  0x23   : > { %s626_s8 = scalar_lea.vmem %s818_s15, 128  ;;  %s709_s9 = smov [#allocation3]  }
  0x24   : > { %p627_p2 = scmp.ne.s32.totalorder %s818_s15, %s626_s8  ;;  %s631_s10 = sshll.u32 %s709_s9, 4  ;;  %s632_s10 = int_to_ptr.vmem [resolvable:$false] %s631_s10 }
  0x25   : > { %s633_s11 = scalar_lea.vmem %s632_s10, 256  ;;  %p634_p11 = scmp.lt.s32.totalorder %s818_s15, %s632_s10 }
  0x26   : > { %p629_p4 = pnand %p627_p2, %p613_p3  ;;  %p635_p5 = scmp.lt.s32.totalorder %s633_s11, %s626_s8 }
  0x28   : > { %p630_p12 = pneg %p629_p4  ;;  %p636_p8 = por %p635_p5, %p634_p11 }
  0x2a   : > { %p637_p9 = pnand %p636_p8, %p630_p12 }
  0x2c   : > { %640 = shalt.err (!%p637_p9)
}
  0x2d   : > { %568 = dma.hbm_to_vmem [thread:$0]  (!%p814_p13), %s810_s13, 128, %s818_s15, %s190_s17  }
  0x2e   : > { %p933_p0 = scmp.lt.s32.totalorder %s707_s23, 3  ;;  %p934_p1 = scmp.ge.s32.totalorder %s707_s23, 1 }
  0x30   : > { %p207_p3 = pnand %p934_p1, %p933_p0 }
  0x31   : > { %s852_s12 = sand.u32 (!%p207_p3), 1, %s699_s21  }
  0x32   : > { %210 = sbr.rel (%p207_p3) target bundleno = 783 (0x30f), region = 40  ;;  %s534_s14 = sshll.u32 (!%p207_p3), %s852_s12, 3 }
  0x33   : > { %s213_s18 = scalar_lea.sflag (!%p207_p3), [#allocation4], %s852_s12  ;;  %s216_s16 = scalar_lea.vmem (!%p207_p3), [#allocation3], %s534_s14 }
  0x39   : > { %686 = dma.done.wait (%p790_p6), %s213_s18, 128  }
  0x3a   : > { %688 = vsyncadd (%p790_p6), %s213_s18, 4294967168  ;;  %vm247_vm0 = vcmask 1043456   ;;  %v243_v1 = vld [vmem:[%s216_s16] sm:$0xff]  ;;  %v710_v6 = vmov 0.0   ;;  %vm711_vm1 = vmmov 0   ;;  %v257_v8 = vlaneseq  ;;  %s546_s26 = sshll.u32 %s768_s2, 7 }
  0x3b   : > { %v245_v2 = vcombine.high %v243_v1, %v243_v1  ;;  %v248_v3 = vsel %vm247_vm0, %v243_v1, 0.0  ;;  %551 = vmatprep.subr.mxu0 %v710_v6  ;;  %v254_v7 = vld [vmem:[%s922_s1] sm:$0xf]  ;;  %556 = vmatprep.subr.mxu1 %v710_v6  ;;  %vm263_vm2 = vcmask 31744   ;;  %vm346_vm3 = vcmask 1040384   ;;  %s242_s27 = scalar_lea.vmem [#allocation6], %s534_s14  ;;  %s877_s10 = scalar_lea.hbm %s926_s5, %s546_s26 }
  0x3c   : > { %552 = vmatpush3.msk.msra.mxu0 %vm247_vm0, %v254_v7  ;;  %553 = vmatprep.mubr.msk.f32.mxu0 %vm711_vm1, %v710_v6  ;;  %v258_v9 = vand.u32 127, %v257_v8  ;;  %v260_v10 = vshrl.u32 %v257_v8, 7  ;;  %v340_v15 = vld [vmem:[%s924_s3] sm:$0x1]  ;;  %vm342_vm4 = vcmask 7168   ;;  %s457_s29 = sshll.u32 %s242_s27, 4  ;;  %s879_s29 = int_to_ptr.vmem [resolvable:$true] %s457_s29 }
  0x3d   : > { %v249_v4 = vsel %vm247_vm0, %v245_v2, 0.0  ;;  %558 = vmatprep.mubr.msk.f32.mxu1 %vm711_vm1, %v710_v6  ;;  %557 = vmatpush3.msk.msra.mxu1 %vm346_vm3, %v340_v15  ;;  %v255_v16 = vld [vmem:[#allocation2] sm:$0x1]  ;;  %v712_v31 = vmov 839922192   ;;  %s443_s11 = scalar_lea.sflag [#allocation5], %s852_s12 }
  0x3e   : > { %v250_v5 = vadd.f32 %v249_v4, %v248_v3  ;;  %v261_v11 = vsub.s32 %v258_v9, %v260_v10  ;;  %v341_v21 = vld [vmem:[%s925_s4] sm:$0x1]  ;;  %v426_v28 = vsub.s32 0, %v260_v10  ;;  %v433_v32 = vunpack.c.l.s4 %v712_v31  ;;  %s641_s18 = scalar_lea.vmem %s879_s29, 128  ;;  %p935_p11 = scmp.ne.s32.totalorder %s930_s6, 0 }
  0x3f   : > { %p642_p6 = scmp.ne.s32.totalorder %s879_s29, %s641_s18  ;;  %s713_s2 = smov [#allocation6]  }
  0x40   : > { %251 = vadd.xlane.f32.xlu0 %v250_v5  ;;  %v434_v33 = vunpack.c.0.s8 %v433_v32  ;;  %s645_s14 = sshll.u32 %s713_s2, 4  ;;  %s646_s14 = int_to_ptr.vmem [resolvable:$false] %s645_s14 }
  0x41   : > { %p643_p12 = pnand %p642_p6, %p935_p11  ;;  %s647_s16 = scalar_lea.vmem %s646_s14, 256 }
  0x42   : > { %v437_v34 = vsub.s32 %v434_v33, %v260_v10  ;;  %p648_p7 = scmp.lt.s32.totalorder %s879_s29, %s646_s14  ;;  %p649_p10 = scmp.lt.s32.totalorder %s647_s16, %s641_s18 }
  0x43   : > { %p644_p13 = pneg %p643_p12 }
  0x44   : > { %p650_p2 = por %p649_p10, %p648_p7 }
  0x46   : > { %p651_p4 = pnand %p650_p2, %p644_p13 }
  0xcd   : > { %v252_v12 = vpop.xlane.xlu0 %251 }
  0xce   : > { %v253_v13 = vmul.f32 0.00390625, %v252_v12 }
  0xd0   : > { %v262_v14 = vrot.slane %v253_v13, %v261_v11 }
  0xd2   : > { %554 = vmatmul.mubr.msk.f32.vlgmr.msra.gmra.mrb[0].mxu0 %vm263_vm2, %v262_v14 }
 0x1a5   : > { %v335_v17 = vpop.f32.mrb[0].mxu0 }
 0x1a6   : > { %v336_v18 = vadd.f32 %v335_v17, %v255_v16  ;;  %v555_v19 = vpop.f32.mrb[1].mxu0 }
 0x1a8   : > { %v339_v20 = vmax.f32 %v336_v18, 0.0 }
 0x1aa   : > { %559 = vmatmul.mubr.msk.f32.vlgmr.msra.gmra.mrb[0].mxu1 %vm342_vm4, %v339_v20 }
 0x27d   : > { %v416_v22 = vpop.f32.mrb[0].mxu1 }
 0x27e   : > { %v417_v23 = vadd.f32 %v416_v22, %v341_v21  ;;  %v560_v24 = vpop.f32.mrb[1].mxu1 }
 0x280   : > { %v420_v25 = vmul.f32 0.16666667, %v417_v23 }
 0x282   : > { %v421_v26 = vadd.f32 0.5, %v420_v25 }
 0x284   : > { %v422_v27 = vmax.f32 %v421_v26, 0.0 }
 0x286   : > { %v423_v29 = vmin.f32 %v422_v27, 1.0 }
 0x288   : > { %v427_v30 = vrot.slane %v423_v29, %v426_v28 }
 0x28a   : > { %429 = vbcast.lane.b32.xlu0 %v427_v30, 256 }
 0x2fc   : > { %v430_v35 = vpop.permute.xlu0 %429 }
 0x2fd   : > { %v438_v36 = vrot.slane %v430_v35, %v437_v34 }
 0x2ff   : > { %v440_v37 = vmul.f32 %v438_v36, %v243_v1 }
 0x301   : > { %441 = vst [vmem:[%s242_s27] sm:$0xff] %v440_v37 }
 0x302   : > { %654 = shalt.err (!%p651_p4)
}
 0x303   : > { %s655_s12 = scalar_lea.hbm %s877_s10, 128  ;;  %s659_s30 = scalar_lea.hbm %s926_s5, 256 }
 0x304   : > { %p656_p5 = scmp.ne.s32.totalorder %s877_s10, %s655_s12  ;;  %p660_p0 = scmp.lt.u32.totalorder %s877_s10, %s926_s5 }
 0x305   : > { %p661_p1 = scmp.lt.u32.totalorder %s659_s30, %s655_s12  ;;  %p663_p6 = scmp.lt.u32.totalorder %s655_s12, %s877_s10 }
 0x306   : > { %p657_p8 = pnand %p656_p5, %p935_p11 }
 0x307   : > { %p662_p3 = por %p661_p1, %p660_p0 }
 0x308   : > { %p658_p9 = pneg %p657_p8 }
 0x309   : > { %p664_p12 = por %p663_p6, %p662_p3 }
 0x30b   : > { %p665_p13 = pnand %p664_p12, %p658_p9 }
 0x30d   : > { %668 = shalt.err (!%p665_p13)
}
 0x30e   : > { %563 = dma.vmem_to_hbm [thread:$0]  (%p935_p11), %s879_s29, 128, %s877_s10, %s443_s11  }
 0x30f PF: > { %s469_s24 = sand.u32 1, %s695_s20   ;;  %p936_p7 = scmp.ne.s32.totalorder %s931_s7, 0 }
 0x310   : > { %p937_p10 = scmp.ge.s32.totalorder %s707_s23, 2  ;;  %s470_s26 = scalar_lea.sflag [#allocation5], %s469_s24 }
 0x312   : > { %p570_p2 = pnand %p937_p10, %p936_p7 }
 0x314   : > { %690 = dma.done.wait (!%p570_p2), %s470_s26, 128  }
 0x315   : > { %692 = vsyncadd (!%p570_p2), %s470_s26, 4294967168  ;;  %p20_p4 = scmp.ge.s32.totalorder %s772_s25, 4   ;;  %s938_s20 = smov %s699_s21 }
 0x316   : > { %s939_s21 = smov %s703_s22  ;;  %s940_s22 = smov %s784_s28 }
 0x317   : > { %s941_s23 = smov %s772_s25  ;;  %22 = sbr.rel (!%p20_p4) target bundleno = 8 (0x8), region = 85 }
 0x31e   :  { %475 = vsyncpa [#allocation4], 1 }
 0x31f   :  { %477 = vsyncpa [#allocation4 + $0x1], 1 }
 0x320   :  { %478 = vsyncpa [#allocation5], 1 }
 0x321   :  { %480 = vsyncpa [#allocation5 + $0x1], 1 }

</bundles_post_ra>
